<compile_context>
chip_gen: v7x
topology: tpu7x:2x2x1
jax: 0.10.0
libtpu: 0.0.40
codegen_flags: <defaults>
</compile_context>

<pallas_src>
import jax
import jax.numpy as jnp
from jax.experimental import pallas as pl
from jax.experimental.pallas import tpu as pltpu


# ---------------------------------------------------------------------------
# Tiling helpers
# ---------------------------------------------------------------------------
def _choose_tile_b(batch, f_in):
    """Lane-stacked samples per tile so the per-tile lane width is exactly 128."""
    if 128 % f_in == 0:
        tb = 128 // f_in
        if tb <= batch and batch % tb == 0:
            return tb
    return batch  # fallback: full batch on lanes (perf cliff, still correct)


def _default_grid_steps(batch, tile_b):
    """1 grid step on single-TensorCore chips (v5e/v6e); 2 'parallel' steps on
    v7x so its two TensorCores each take half of the batch."""
    tiles = batch // tile_b
    kind = ""
    try:
        kind = jax.devices()[0].device_kind.lower()
    except Exception:
        pass
    if "v7" in kind and tiles >= 2 and tiles % 2 == 0:
        return 2
    return 1


# ---------------------------------------------------------------------------
# One-time parameter packing (hoisted out of the per-forward hot path)
# ---------------------------------------------------------------------------
def _pack_constants(params, a_hat, tile_b, n_groups):
    w1, b1, w2, b2, wo, bo = params
    f_in, c1 = w1.shape
    c2 = w2.shape[1]
    d_in, d_h1, d_h2 = tile_b * f_in, tile_b * c1, tile_b * c2

    # Block-diagonal weights stored at HALF-tile granularity: kron(I_{tb/2}, W).
    # The two lane halves of a tile are independent samples, so each transform
    # becomes two matmuls that reuse the same (2-4x smaller) RHS.
    splits = 2 if tile_b % 2 == 0 else 1
    reps = tile_b // splits
    eye = jnp.eye(reps, dtype=jnp.float32)
    w1h = jnp.kron(eye, w1).astype(jnp.bfloat16)   # [reps*F_in, reps*16]
    w2h = jnp.kron(eye, w2).astype(jnp.bfloat16)   # [reps*16,   reps*32]
    woh = jnp.kron(eye, wo).astype(jnp.bfloat16)   # [reps*32,   reps*F_in]

    # All three (tiny) biases packed into one small buffer -> one DMA.
    lanes = max(d_in, d_h1, d_h2)
    biases = jnp.zeros((8, lanes), jnp.float32)
    biases = biases.at[0:1, :d_h1].set(jnp.tile(b1, (1, tile_b)))
    biases = biases.at[1:2, :d_h2].set(jnp.tile(b2, (1, tile_b)))
    biases = biases.at[2:3, :d_in].set(jnp.tile(bo, (1, tile_b)))
    biases = biases.astype(jnp.bfloat16)

    # Block-diagonal adjacency for sample-groups stacked on the sublane axis.
    a_blk = jnp.kron(jnp.eye(n_groups, dtype=jnp.float32), a_hat).astype(jnp.bfloat16)

    layout = dict(dims=(d_in, d_h1, d_h2), splits=splits)
    return a_blk, (w1h, w2h, woh, biases), layout


# ---------------------------------------------------------------------------
# Kernel
# ---------------------------------------------------------------------------
def _make_kernel(layout):
    d_in, d_h1, d_h2 = layout["dims"]
    splits = layout["splits"]
    f32, bf16 = jnp.float32, jnp.bfloat16

    def bd_matmul(h_f32, w_ref, d_from):
        """Block-diagonal feature transform: split the lane axis into `splits`
        independent sample-halves and reuse the same small RHS for each (skips
        the all-zero off-diagonal weight tiles). Concats are 128-lane aligned."""
        hb = h_f32.astype(bf16)
        w = w_ref[...]
        si = d_from // splits
        pieces = [jnp.dot(hb[:, k * si:(k + 1) * si], w, preferred_element_type=f32)
                  for k in range(splits)]
        return pieces[0] if splits == 1 else jnp.concatenate(pieces, axis=-1)

    def kernel(a_ref, x_ref, w1_ref, w2_ref, wo_ref, b_ref, o_ref):
        a = a_ref[...]                    # [G*N, G*N] block-diag normalized adjacency
        x = x_ref[...]                    # [G*N, tb*F_in] lane-stacked node features
        b1 = b_ref[0:1, :d_h1]
        b2 = b_ref[1:2, :d_h2]
        bo = b_ref[2:3, :d_in]

        # GCNConv 1: aggregate-then-transform (associativity; narrower K first).
        ax = jnp.dot(a, x, preferred_element_type=f32)
        h = jnp.maximum(bd_matmul(ax, w1_ref, d_in) + b1, 0.0)
        # TODO(synk): dropout omitted (is_training=False -> identity in eval mode).

        # GCNConv 2 (hidden layer).
        ah = jnp.dot(a, h.astype(bf16), preferred_element_type=f32)
        h = jnp.maximum(bd_matmul(ah, w2_ref, d_h1) + b2, 0.0)

        # Output Linear (per node): each sample-half written to its own lane slab.
        hb = h.astype(bf16)
        wo = wo_ref[...]
        si, so = d_h2 // splits, d_in // splits
        for k in range(splits):
            yk = jnp.dot(hb[:, k * si:(k + 1) * si], wo, preferred_element_type=f32)
            yk = yk + bo[:, k * so:(k + 1) * so]
            o_ref[:, k * so:(k + 1) * so] = yk.astype(o_ref.dtype)

    return kernel


# ---------------------------------------------------------------------------
# Public API: pack once, return a jitted forward
# ---------------------------------------------------------------------------
def prepare_motion_gcn(params, a_hat, batch, n_frames, n_vertices, n_node_features,
                       *, tile_b=None, n_grid_steps=None):
    """Packs parameters ONCE (kron block-diag weights, bf16 casts, block-diag
    adjacency) and returns a jitted forward:
        forward(x: [B, n_nodes, F]) -> [B, n_frames, n_vertices, F]."""
    n_nodes = n_frames * n_vertices
    f_in = n_node_features
    if tile_b is None:
        tile_b = _choose_tile_b(batch, f_in)
    assert batch % tile_b == 0
    if n_grid_steps is None:
        n_grid_steps = _default_grid_steps(batch, tile_b)
    samples_per_step = batch // n_grid_steps
    assert samples_per_step % tile_b == 0
    n_groups = samples_per_step // tile_b      # sample-groups stacked on sublanes
    n_steps = n_grid_steps

    a_blk, weights, layout = _pack_constants(params, a_hat, tile_b, n_groups)
    kernel = _make_kernel(layout)

    N, G, tb, F = n_nodes, n_groups, tile_b, f_in
    M, lanes = G * N, tb * F

    call = pl.pallas_call(
        kernel,
        out_shape=jax.ShapeDtypeStruct((M, n_steps * lanes), jnp.float32),
        grid_spec=pltpu.PrefetchScalarGridSpec(
            num_scalar_prefetch=0,
            grid=(n_steps,),
            in_specs=[
                pl.BlockSpec((M, M), lambda i: (0, 0)),              # A_blk: resident
                pl.BlockSpec((M, lanes), lambda i: (0, i)),          # x: batch tile on lanes
                pl.BlockSpec(weights[0].shape, lambda i: (0, 0)),    # w1 (half block-diag)
                pl.BlockSpec(weights[1].shape, lambda i: (0, 0)),    # w2 (half block-diag)
                pl.BlockSpec(weights[2].shape, lambda i: (0, 0)),    # w_out (half block-diag)
                pl.BlockSpec(weights[3].shape, lambda i: (0, 0)),    # packed biases
            ],
            out_specs=pl.BlockSpec((M, lanes), lambda i: (0, i)),
        ),
        compiler_params=pltpu.CompilerParams(
            dimension_semantics=("parallel",)),                      # megacore over batch (v7x)
    )

    @jax.jit
    def forward(x_batched):
        # sample s = st*G*tb + g*tb + b  ->  (row g*N + n, grid step st, lane b*F + f)
        # TODO(synk): layout transposes stay in XLA (tiny at this size); fold into a
        # 3-D BlockSpec only if B/N grow.
        x5 = x_batched.reshape(n_steps, G, tb, N, F)
        x_ls = x5.transpose(1, 3, 0, 2, 4).reshape(M, n_steps * lanes)
        out = call(a_blk, x_ls.astype(jnp.bfloat16), *weights)
        y = out.reshape(G, N, n_steps, tb, F).transpose(2, 0, 3, 1, 4)
        y = y.reshape(batch, N, F)
        return y.reshape(batch, n_frames, n_vertices, F)

    return forward


# ---------------------------------------------------------------------------
# Graph construction, init, reference
# ---------------------------------------------------------------------------
def build_norm_adj(edge_index, n_nodes):
    """Dense D^-1/2 (A + I) D^-1/2 matching PyG GCNConv default normalization.
    Duplicate edges coalesced; self loops added only where missing."""
    src, dst = edge_index[0], edge_index[1]
    a = jnp.zeros((n_nodes, n_nodes), jnp.float32).at[dst, src].add(1.0)
    a = jnp.minimum(a, 1.0)
    a = jnp.maximum(a, jnp.eye(n_nodes, dtype=jnp.float32))
    deg = a.sum(axis=1)
    dinv = 1.0 / jnp.sqrt(deg)
    return dinv[:, None] * a * dinv[None, :]


def make_motion_edge_index(n_frames, n_vertices):
    """Star within each frame (vertices <-> vertex 0) + temporal links between
    corresponding vertices of consecutive frames. Undirected (both directions)."""
    edges = []
    for f in range(n_frames):
        base = f * n_vertices
        for v in range(1, n_vertices):
            edges.append((base, base + v))
            edges.append((base + v, base))
        if f + 1 < n_frames:
            nxt = (f + 1) * n_vertices
            for v in range(n_vertices):
                edges.append((base + v, nxt + v))
                edges.append((nxt + v, base + v))
    return jnp.array(edges, dtype=jnp.int32).T                       # [2, E]


def init_params(key, n_node_features, n_hidden_layers=1):
    """Deterministic parameter init (shapes follow MotionGCN.__init__, n_hidden_layers=1)."""
    ks = jax.random.split(key, 6)
    c0, c1, c2 = n_node_features, 16, 16 * (n_hidden_layers + 1)     # 8 -> 16 -> 32
    scale = 0.1
    w1 = scale * jax.random.normal(ks[0], (c0, c1), jnp.float32)
    b1 = scale * jax.random.normal(ks[1], (1, c1), jnp.float32)
    w2 = scale * jax.random.normal(ks[2], (c1, c2), jnp.float32)
    b2 = scale * jax.random.normal(ks[3], (1, c2), jnp.float32)
    # nn.Linear(32, F): y = x @ W.T + b ; stored pre-transposed as [32, F]
    wo = scale * jax.random.normal(ks[4], (c2, c0), jnp.float32)
    bo = scale * jax.random.normal(ks[5], (1, c0), jnp.float32)
    return (w1, b1, w2, b2, wo, bo)


def ref_forward(x_b, a_hat, params):
    """Plain-JAX reference mirroring the kernel's bf16-operand / f32-accumulate math."""
    w1, b1, w2, b2, wo, bo = params
    hi = jax.lax.Precision.HIGHEST
    c = lambda t: t.astype(jnp.bfloat16).astype(jnp.float32)
    a = c(a_hat)
    x = c(x_b)                                                       # [B, N, F]
    ax = jnp.einsum("ij,bjf->bif", a, x, precision=hi)
    h = jnp.einsum("bif,fc->bic", c(ax), c(w1), precision=hi) + c(b1)
    h = jnp.maximum(h, 0.0)
    ah = jnp.einsum("ij,bjc->bic", a, c(h), precision=hi)
    h = jnp.einsum("bic,cd->bid", c(ah), c(w2), precision=hi) + c(b2)
    h = jnp.maximum(h, 0.0)
    y = jnp.einsum("bid,df->bif", c(h), c(wo), precision=hi) + c(bo)
    return y                                                         # [B, N, F]


if __name__ == "__main__":
    # Module config: n_vertices=6, n_frames=5 -> n_nodes=30; 32 independent samples
    # sharing the motion graph are lane-stacked (16/step) and sublane-stacked so the
    # kernel runs 1 grid step on v5e/v6e and 2 parallel steps on v7x.
    n_vertices = 6
    n_frames = 5
    n_nodes = n_frames * n_vertices
    n_node_features = 8
    batch = 32
    is_training = False            # dropout is identity in eval mode

    key = jax.random.PRNGKey(0)
    kx, kp = jax.random.split(key)
    x = jax.random.normal(kx, (batch, n_nodes, n_node_features), jnp.float32)
    edge_index = make_motion_edge_index(n_frames, n_vertices)
    a_hat = build_norm_adj(edge_index, n_nodes)
    params = init_params(kp, n_node_features, n_hidden_layers=1)

    # Packing happens ONCE here (not in the per-call path).
    forward = prepare_motion_gcn(params, a_hat, batch, n_frames, n_vertices,
                                 n_node_features)

    out = forward(x)
    out = jax.block_until_ready(out)
    out = jax.block_until_ready(forward(x))       # second call: no re-packing/tracing

    ref = ref_forward(x, a_hat, params).reshape(
        batch, n_frames, n_vertices, n_node_features)

    assert out.shape == (batch, n_frames, n_vertices, n_node_features)
    assert bool(jnp.all(jnp.isfinite(out)))
    assert bool(jnp.allclose(out, ref, rtol=2e-2, atol=2e-3)), \
        float(jnp.max(jnp.abs(out - ref)))
    print("KERNEL_OK")
</pallas_src>

<mosaic_0001>
module attributes {stable_mosaic.version = 11 : i64} {
  func.func @kernel(%arg0: i32, %arg1: memref<60x60xbf16, #tpu.memory_space<vmem>>, %arg2: memref<60x128xbf16, #tpu.memory_space<vmem>>, %arg3: memref<64x128xbf16, #tpu.memory_space<vmem>>, %arg4: memref<128x256xbf16, #tpu.memory_space<vmem>>, %arg5: memref<256x64xbf16, #tpu.memory_space<vmem>>, %arg6: memref<8x512xbf16, #tpu.memory_space<vmem>>, %arg7: memref<60x128xf32, #tpu.memory_space<vmem>>) attributes {dimension_semantics = [#tpu.dimension_semantics<parallel>], iteration_bounds = array<i64: 1>, scalar_prefetch = 0 : i64, scratch_operands = 0 : i64, tpu.core_type = #tpu.core_type<tc>, window_params = [{pipeline_mode = #tpu.pipeline_mode<synchronous>, transform_indices = @transform_0, window_bounds = array<i64: 60, 60>}, {transform_indices = @transform_1, window_bounds = array<i64: 60, 128>}, {pipeline_mode = #tpu.pipeline_mode<synchronous>, transform_indices = @transform_2, window_bounds = array<i64: 64, 128>}, {pipeline_mode = #tpu.pipeline_mode<synchronous>, transform_indices = @transform_3, window_bounds = array<i64: 128, 256>}, {pipeline_mode = #tpu.pipeline_mode<synchronous>, transform_indices = @transform_4, window_bounds = array<i64: 256, 64>}, {pipeline_mode = #tpu.pipeline_mode<synchronous>, transform_indices = @transform_5, window_bounds = array<i64: 8, 512>}, {transform_indices = @transform_6, window_bounds = array<i64: 60, 128>}]} {
    %c0 = arith.constant 0 : index
    %c0_0 = arith.constant 0 : index
    %0 = vector.load %arg1[%c0, %c0_0] : memref<60x60xbf16, #tpu.memory_space<vmem>>, vector<60x60xbf16>
    %c0_1 = arith.constant 0 : index
    %c0_2 = arith.constant 0 : index
    %1 = vector.load %arg2[%c0_1, %c0_2] : memref<60x128xbf16, #tpu.memory_space<vmem>>, vector<60x128xbf16>
    %c0_3 = arith.constant 0 : index
    %c0_4 = arith.constant 0 : index
    %2 = vector.load %arg6[%c0_3, %c0_4] : memref<8x512xbf16, #tpu.memory_space<vmem>>, vector<1x256xbf16>
    %c1 = arith.constant 1 : index
    %c0_5 = arith.constant 0 : index
    %3 = vector.load %arg6[%c1, %c0_5] : memref<8x512xbf16, #tpu.memory_space<vmem>>, vector<1x512xbf16>
    %c2 = arith.constant 2 : index
    %c0_6 = arith.constant 0 : index
    %4 = vector.load %arg6[%c2, %c0_6] : memref<8x512xbf16, #tpu.memory_space<vmem>>, vector<1x128xbf16>
    %cst = arith.constant dense<0.000000e+00> : vector<60x128xf32>
    %5 = tpu.matmul %0, %1, %cst {dimension_numbers = #tpu.dot_dimension_numbers<[1], [0], [0], [1], [0, 0, 1, 1], [], []>} : vector<60x60xbf16>, vector<60x128xbf16>, vector<60x128xf32> -> vector<60x128xf32>
    %6 = arith.truncf %5 : vector<60x128xf32> to vector<60x128xbf16>
    %c0_7 = arith.constant 0 : index
    %c0_8 = arith.constant 0 : index
    %7 = vector.load %arg3[%c0_7, %c0_8] : memref<64x128xbf16, #tpu.memory_space<vmem>>, vector<64x128xbf16>
    %8 = vector.extract_strided_slice %6 {offsets = [0, 0], sizes = [60, 64], strides = [1, 1]} : vector<60x128xbf16> to vector<60x64xbf16>
    %cst_9 = arith.constant dense<0.000000e+00> : vector<60x128xf32>
    %9 = tpu.matmul %8, %7, %cst_9 {dimension_numbers = #tpu.dot_dimension_numbers<[1], [0], [0], [1], [0, 0, 1, 1], [], []>} : vector<60x64xbf16>, vector<64x128xbf16>, vector<60x128xf32> -> vector<60x128xf32>
    %10 = vector.extract_strided_slice %6 {offsets = [0, 64], sizes = [60, 64], strides = [1, 1]} : vector<60x128xbf16> to vector<60x64xbf16>
    %cst_10 = arith.constant dense<0.000000e+00> : vector<60x128xf32>
    %11 = tpu.matmul %10, %7, %cst_10 {dimension_numbers = #tpu.dot_dimension_numbers<[1], [0], [0], [1], [0, 0, 1, 1], [], []>} : vector<60x64xbf16>, vector<64x128xbf16>, vector<60x128xf32> -> vector<60x128xf32>
    %12 = tpu.concatenate %9, %11 in 1 : vector<60x128xf32>, vector<60x128xf32> -> vector<60x256xf32>
    %13 = arith.extf %2 : vector<1x256xbf16> to vector<1x256xf32>
    %14 = vector.broadcast %13 : vector<1x256xf32> to vector<60x256xf32>
    %15 = arith.addf %12, %14 : vector<60x256xf32>
    %cst_11 = arith.constant 0.000000e+00 : f32
    %16 = vector.broadcast %cst_11 : f32 to vector<60x256xf32>
    %17 = arith.maximumf %15, %16 : vector<60x256xf32>
    %18 = arith.truncf %17 : vector<60x256xf32> to vector<60x256xbf16>
    %cst_12 = arith.constant dense<0.000000e+00> : vector<60x256xf32>
    %19 = tpu.matmul %0, %18, %cst_12 {dimension_numbers = #tpu.dot_dimension_numbers<[1], [0], [0], [1], [0, 0, 1, 1], [], []>} : vector<60x60xbf16>, vector<60x256xbf16>, vector<60x256xf32> -> vector<60x256xf32>
    %20 = arith.truncf %19 : vector<60x256xf32> to vector<60x256xbf16>
    %c0_13 = arith.constant 0 : index
    %c0_14 = arith.constant 0 : index
    %21 = vector.load %arg4[%c0_13, %c0_14] : memref<128x256xbf16, #tpu.memory_space<vmem>>, vector<128x256xbf16>
    %22 = vector.extract_strided_slice %20 {offsets = [0, 0], sizes = [60, 128], strides = [1, 1]} : vector<60x256xbf16> to vector<60x128xbf16>
    %cst_15 = arith.constant dense<0.000000e+00> : vector<60x256xf32>
    %23 = tpu.matmul %22, %21, %cst_15 {dimension_numbers = #tpu.dot_dimension_numbers<[1], [0], [0], [1], [0, 0, 1, 1], [], []>} : vector<60x128xbf16>, vector<128x256xbf16>, vector<60x256xf32> -> vector<60x256xf32>
    %24 = vector.extract_strided_slice %20 {offsets = [0, 128], sizes = [60, 128], strides = [1, 1]} : vector<60x256xbf16> to vector<60x128xbf16>
    %cst_16 = arith.constant dense<0.000000e+00> : vector<60x256xf32>
    %25 = tpu.matmul %24, %21, %cst_16 {dimension_numbers = #tpu.dot_dimension_numbers<[1], [0], [0], [1], [0, 0, 1, 1], [], []>} : vector<60x128xbf16>, vector<128x256xbf16>, vector<60x256xf32> -> vector<60x256xf32>
    %26 = tpu.concatenate %23, %25 in 1 : vector<60x256xf32>, vector<60x256xf32> -> vector<60x512xf32>
    %27 = arith.extf %3 : vector<1x512xbf16> to vector<1x512xf32>
    %28 = vector.broadcast %27 : vector<1x512xf32> to vector<60x512xf32>
    %29 = arith.addf %26, %28 : vector<60x512xf32>
    %cst_17 = arith.constant 0.000000e+00 : f32
    %30 = vector.broadcast %cst_17 : f32 to vector<60x512xf32>
    %31 = arith.maximumf %29, %30 : vector<60x512xf32>
    %32 = arith.truncf %31 : vector<60x512xf32> to vector<60x512xbf16>
    %c0_18 = arith.constant 0 : index
    %c0_19 = arith.constant 0 : index
    %33 = vector.load %arg5[%c0_18, %c0_19] : memref<256x64xbf16, #tpu.memory_space<vmem>>, vector<256x64xbf16>
    %34 = vector.extract_strided_slice %32 {offsets = [0, 0], sizes = [60, 256], strides = [1, 1]} : vector<60x512xbf16> to vector<60x256xbf16>
    %cst_20 = arith.constant dense<0.000000e+00> : vector<60x64xf32>
    %35 = tpu.matmul %34, %33, %cst_20 {dimension_numbers = #tpu.dot_dimension_numbers<[1], [0], [0], [1], [0, 0, 1, 1], [], []>} : vector<60x256xbf16>, vector<256x64xbf16>, vector<60x64xf32> -> vector<60x64xf32>
    %36 = vector.extract_strided_slice %4 {offsets = [0, 0], sizes = [1, 64], strides = [1, 1]} : vector<1x128xbf16> to vector<1x64xbf16>
    %37 = arith.extf %36 : vector<1x64xbf16> to vector<1x64xf32>
    %38 = vector.broadcast %37 : vector<1x64xf32> to vector<60x64xf32>
    %39 = arith.addf %35, %38 : vector<60x64xf32>
    %c0_21 = arith.constant 0 : index
    %c0_22 = arith.constant 0 : index
    %40 = vector.load %arg7[%c0_21, %c0_22] : memref<60x128xf32, #tpu.memory_space<vmem>>, vector<60x64xf32>
    tpu.vector_store %arg7[%c0_21, %c0_22], %39 {strides = array<i32>} : memref<60x128xf32, #tpu.memory_space<vmem>>, vector<60x64xf32>,
    %41 = vector.extract_strided_slice %32 {offsets = [0, 256], sizes = [60, 256], strides = [1, 1]} : vector<60x512xbf16> to vector<60x256xbf16>
    %cst_23 = arith.constant dense<0.000000e+00> : vector<60x64xf32>
    %42 = tpu.matmul %41, %33, %cst_23 {dimension_numbers = #tpu.dot_dimension_numbers<[1], [0], [0], [1], [0, 0, 1, 1], [], []>} : vector<60x256xbf16>, vector<256x64xbf16>, vector<60x64xf32> -> vector<60x64xf32>
    %43 = vector.extract_strided_slice %4 {offsets = [0, 64], sizes = [1, 64], strides = [1, 1]} : vector<1x128xbf16> to vector<1x64xbf16>
    %44 = arith.extf %43 : vector<1x64xbf16> to vector<1x64xf32>
    %45 = vector.broadcast %44 : vector<1x64xf32> to vector<60x64xf32>
    %46 = arith.addf %42, %45 : vector<60x64xf32>
    %c0_24 = arith.constant 0 : index
    %c64 = arith.constant 64 : index
    %47 = vector.load %arg7[%c0_24, %c64] : memref<60x128xf32, #tpu.memory_space<vmem>>, vector<60x64xf32>
    tpu.vector_store %arg7[%c0_24, %c64], %46 {strides = array<i32>} : memref<60x128xf32, #tpu.memory_space<vmem>>, vector<60x64xf32>,
    return
  }
  func.func @transform_0(%arg0: i32) -> (i32, i32) {
    %c0_i32 = arith.constant 0 : i32
    %c0_i32_0 = arith.constant 0 : i32
    %c0_i32_1 = arith.constant 0 : i32
    return %c0_i32, %c0_i32_0 : i32, i32
  }
  func.func @transform_1(%arg0: i32) -> (i32, i32) {
    %c0_i32 = arith.constant 0 : i32
    %c0_i32_0 = arith.constant 0 : i32
    return %c0_i32, %arg0 : i32, i32
  }
  func.func @transform_2(%arg0: i32) -> (i32, i32) {
    %c0_i32 = arith.constant 0 : i32
    %c0_i32_0 = arith.constant 0 : i32
    %c0_i32_1 = arith.constant 0 : i32
    return %c0_i32, %c0_i32_0 : i32, i32
  }
  func.func @transform_3(%arg0: i32) -> (i32, i32) {
    %c0_i32 = arith.constant 0 : i32
    %c0_i32_0 = arith.constant 0 : i32
    %c0_i32_1 = arith.constant 0 : i32
    return %c0_i32, %c0_i32_0 : i32, i32
  }
  func.func @transform_4(%arg0: i32) -> (i32, i32) {
    %c0_i32 = arith.constant 0 : i32
    %c0_i32_0 = arith.constant 0 : i32
    %c0_i32_1 = arith.constant 0 : i32
    return %c0_i32, %c0_i32_0 : i32, i32
  }
  func.func @transform_5(%arg0: i32) -> (i32, i32) {
    %c0_i32 = arith.constant 0 : i32
    %c0_i32_0 = arith.constant 0 : i32
    %c0_i32_1 = arith.constant 0 : i32
    return %c0_i32, %c0_i32_0 : i32, i32
  }
  func.func @transform_6(%arg0: i32) -> (i32, i32) {
    %c0_i32 = arith.constant 0 : i32
    %c0_i32_0 = arith.constant 0 : i32
    return %c0_i32, %arg0 : i32, i32
  }
}

</mosaic_0001>

<bundles_post_ra>
// kernel: forward.1
= control target key start
LH: loop header
LB: loop body
LE: loop exit
PB: predicated region body
PF: predicated region fallthrough
CT: control target
= control target key end

     0   :  { %vm87_vm0 = vcmask 490496   ;;  %vm100_vm1 = vcmask 1045504   ;;  %vm205_vm2 = vcmask 523264   ;;  %v374_v29 = vlaneseq  ;;  %s1868_s1 = inlined_call_operand.vmem [shape: bf16[60,128], index: 1, kind: input, shape index: {}]   ;;  %s1869_s0 = inlined_call_operand.vmem [shape: bf16[60,60], index: 0, kind: input, shape index: {}]   ;;  %s1870_s2 = inlined_call_operand.vmem [shape: bf16[64,128], index: 2, kind: input, shape index: {}]   ;;  %s1871_s5 = inlined_call_operand.vmem [shape: bf16[8,512], index: 5, kind: input, shape index: {}]   ;;  %s1872_s3 = inlined_call_operand.vmem [shape: bf16[128,256], index: 3, kind: input, shape index: {}]   ;;  %s1873_s4 = inlined_call_operand.vmem [shape: bf16[256,64], index: 4, kind: input, shape index: {}]   ;;  %s1874_s6 = inlined_call_operand.vmem [shape: f32[60,128], index: 6, kind: output, shape index: {}]  }
   0x1   :  { %v1389_v0 = vld [vmem:[%s1868_s1] sm:$0xff]   ;;  %v1390_v1 = vld [vmem:[%s1868_s1 + $0x8] sm:$0xff]   ;;  %v1391_v2 = vld [vmem:[%s1868_s1 + $0x10] sm:$0xff]   ;;  %v1442_v61 = vmov 0   ;;  %vm1056_vm3 = vcmask 519168   ;;  %vm1159_vm4 = vcmask 1048064  }
   0x2   :  { %1338 = vmatprep.subr.bf16.mxu0 %v1389_v0  ;;  %v1490_v3 = vld [vmem:[%s1869_s0] sm:$0xff]   ;;  %v1392_v4 = vld [vmem:[%s1868_s1 + $0x18] sm:$0x3f]   ;;  %v1398_v6 = vld [vmem:[%s1870_s2 + $0x8] sm:$0xff]   ;;  %v1544_v30 = vshrl.u32 %v374_v29, 7  ;;  %vm1167_vm5 = vcmask 1043968  }
   0x3   :  { %1339 = vmatpush3.bf16.msra.mxu0 %v1389_v0  ;;  %1346 = vmatprep.mubr.msk.bf16.mxu0 %vm87_vm0, %v1490_v3  ;;  %v1397_v5 = vld [vmem:[%s1870_s2] sm:$0xff]   ;;  %v102_v7 = vsel %vm100_vm1, %v1392_v4, 0  ;;  %v1399_v8 = vld [vmem:[%s1870_s2 + $0x10] sm:$0xff]   ;;  %v1511_v9 = vld [vmem:[%s1869_s0 + $0x8] sm:$0xff]  }
   0x4   :  { %1340 = vmatprep.subr.bf16.mxu0 %v1390_v1  ;;  %1354 = vmatprep.subr.bf16.mxu1 %v1397_v5  ;;  %v1516_v10 = vld [vmem:[%s1869_s0 + $0x10] sm:$0xff]   ;;  %v1525_v11 = vld [vmem:[%s1869_s0 + $0x18] sm:$0x3f]   ;;  %s1441_s0 = smov 64   ;;  %v1549_v31 = vld [vmem:[%s1871_s5] sm:$0x11] }
   0x5   :  { %1355 = vmatpush3.bf16.msra.mxu1 %v1397_v5  ;;  %v1400_v12 = vld [vmem:[%s1870_s2 + $0x18] sm:$0xff]   ;;  %v372_v32 = vunpack.c.l.bf16 %v1549_v31  ;;  %v376_v33 = vsub.s32 0, %v1544_v30  ;;  %v1568_v0 = vld [vmem:[%s1872_s3] ss:$8 sps:$4 sm:$0xff]  }
   0x6   :  { %1356 = vmatprep.subr.bf16.mxu1 %v1398_v6 }
   0x7   :  { %1341 = vmatpush3.bf16.msra.mxu0 %v1390_v1  ;;  %v377_v34 = vrot.slane %v372_v32, %v376_v33  ;;  %v1573_v1 = vld [vmem:[%s1872_s3 + $0x4] ss:$8 sps:$4 sm:$0xff]  }
   0x8   :  { %1342 = vmatprep.subr.bf16.mxu0 %v1391_v2 }
   0x9   :  { %1357 = vmatpush3.bf16.msra.mxu1 %v1398_v6 }
   0xa   :  { %1358 = vmatprep.subr.bf16.mxu1 %v1399_v8 }
   0xb   :  { %1343 = vmatpush3.bf16.msra.mxu0 %v1391_v2  ;;  %v1578_v2 = vld [vmem:[%s1872_s3 + $0x14] ss:$8 sps:$4 sm:$0xff]  }
   0xc   :  { %1386 = vmatprep.subr.msk.bf16.mxu0 %vm100_vm1, %v1392_v4  ;;  %v1585_v4 = vld [vmem:[%s1872_s3 + $0x10] ss:$8 sps:$4 sm:$0xff]  }
   0xd   :  { %1359 = vmatpush3.bf16.msra.mxu1 %v1399_v8 }
   0xe   :  { %1360 = vmatprep.subr.bf16.mxu1 %v1400_v12 }
   0xf   :  { %1345 = vmatpush3.bf16.msra.mxu0 %v102_v7  ;;  %v1603_v7 = vld [vmem:[%s1872_s3 + $0x34] ss:$8 sps:$4 sm:$0xff]  }
  0x10   :  { %1370 = vmatprep.subr.bf16.mxu0 %v1397_v5 }
  0x11   :  { %1361 = vmatpush3.bf16.msra.mxu1 %v1400_v12 }
  0x12   :  { %1347 = vmatmul.mubr.msk.bf16.vlgmr.msra.gmra.mrb[0].mxu0 %vm87_vm0, %v1511_v9 }
  0x13   :  { %1350 = vmatprep.mubr.msk.bf16.mxu0 %vm87_vm0, %v1516_v10  ;;  %1371 = vmatpush3.bf16.msra.mxu0 %v1397_v5  ;;  %v1591_v5 = vld [vmem:[%s1872_s3 + $0x24] ss:$8 sps:$4 sm:$0xff]  }
  0x14   :  { %1372 = vmatprep.subr.bf16.mxu0 %v1398_v6 }
  0x17   :  { %1373 = vmatpush3.bf16.msra.mxu0 %v1398_v6  ;;  %v1597_v6 = vld [vmem:[%s1872_s3 + $0x20] ss:$8 sps:$4 sm:$0xff]  }
  0x18   :  { %1374 = vmatprep.subr.bf16.mxu0 %v1399_v8 }
  0x1a   :  { %1351 = vmatmul.mubr.msk.bf16.gmra.mrb[4].mxu0 %vm87_vm0, %v1525_v11 }
  0x1b   :  { %1375 = vmatpush3.bf16.msra.mxu0 %v1399_v8  ;;  %v1609_v8 = vld [vmem:[%s1872_s3 + $0x30] ss:$8 sps:$4 sm:$0xff]  }
  0x1c   :  { %1376 = vmatprep.subr.bf16.mxu0 %v1400_v12 }
  0x1f   :  { %1377 = vmatpush3.bf16.msra.mxu0 %v1400_v12  ;;  %v1615_v12 = vld [vmem:[%s1872_s3 + $0x44] ss:$8 sps:$4 sm:$0xff]  }
  0x20   :  { %605 = vmatprep.subr.bf16.mxu0 %v1573_v1 }
  0xe5   :  { %v1348_v13 = vpop.f32.mrb[0].mxu0 }
  0xe6   :  { %v138_v14 = vpop.f32.mrb[1].mxu0 }
  0xe7   :  { %v1349_v15 = vpop.f32.mrb[2].mxu0 }
  0xe8   :  { %v170_v16 = vpack.c.bf16 %v1349_v15, %v1348_v13  ;;  %v141_v17 = vpop.f32.mrb[3].mxu0  ;;  %v1621_v13 = vld [vmem:[%s1872_s3 + $0x40] ss:$8 sps:$4 sm:$0xff]   ;;  %v1416_v15 = vld [vmem:[%s1872_s3 + $0x50] ss:$8 sps:$4 sm:$0xff]  }
  0xe9   :  { %v169_v18 = vpack.c.bf16 %v141_v17, %v138_v14  ;;  %v1627_v14 = vld [vmem:[%s1872_s3 + $0x54] ss:$8 sps:$4 sm:$0xff]   ;;  %v1419_v17 = vld [vmem:[%s1872_s3 + $0x60] ss:$8 sps:$4 sm:$0xff]  }
  0xeb   :  { %287 = vrot.lane.b32.xlu0 %v169_v18, %s1441_s0  ;;  %1362 = vmatprep.mubr.msk.bf16.mxu1 %vm205_vm2, %v169_v18  ;;  %v373_v18 = vunpack.c.h.bf16 %v1549_v31 }
  0xec   :  { %1363 = vmatmul.mubr.msk.bf16.vlgmr.msra.gmra.mrb[0].mxu1 %vm205_vm2, %v170_v16 }
  0xed   :  { %v1352_v19 = vpop.f32.mrb[4].mxu0 }
  0xee   :  { %v154_v20 = vpop.f32.mrb[5].mxu0 }
  0xef   :  { %289 = vrot.lane.b32.xlu0 %v170_v16, %s1441_s0  ;;  %v1353_v21 = vpop.f32.mrb[6].mxu0  ;;  %v1421_v16 = vld [vmem:[%s1872_s3 + $0x64] ss:$8 sps:$4 sm:$0xff]  }
  0xf0   :  { %v172_v22 = vpack.c.bf16 %v1353_v21, %v1352_v19  ;;  %v157_v23 = vpop.f32.mrb[7].mxu0  ;;  %v381_v19 = vrot.slane %v373_v18, %v376_v33 }
  0xf1   :  { %v171_v24 = vpack.c.bf16 %v157_v23, %v154_v20 }
  0xf3   :  { %291 = vrot.lane.b32.xlu1 %v171_v24, %s1441_s0  ;;  %1366 = vmatprep.mubr.msk.bf16.mxu1 %vm205_vm2, %v171_v24 }
  0xf4   :  { %1367 = vmatmul.mubr.msk.bf16.gmra.mrb[4].mxu1 %vm205_vm2, %v172_v22 }
  0xf5   :  { %460 = vmatprep.mubr.bf16.mxu1 %v1442_v61 }
  0xf7   :  { %293 = vrot.lane.b32.xlu1 %v172_v22, %s1441_s0 }
 0x15d   :  { %v288_v25 = vpop.permute.xlu0 %287 }
 0x15e   :  { %1378 = vmatprep.mubr.msk.bf16.mxu0 %vm205_vm2, %v288_v25 }
 0x161   :  { %v290_v26 = vpop.permute.xlu0 %289 }
 0x162   :  { %1379 = vmatmul.mubr.msk.bf16.vlgmr.msra.gmra.mrb[8].mxu0 %vm205_vm2, %v290_v26 }
 0x163   :  { %606 = vmatpush1.bf16.msra.mxu0 %v1568_v0 }
 0x164   :  { %607 = vmatprep.subr.bf16.mxu0 %v1578_v2 }
 0x165   :  { %v292_v27 = vpop.permute.xlu1 %291 }
 0x166   :  { %1382 = vmatprep.mubr.msk.bf16.mxu0 %vm205_vm2, %v292_v27 }
 0x167   :  { %608 = vmatpush1.bf16.msra.mxu0 %v1585_v4 }
 0x168   :  { %609 = vmatprep.subr.bf16.mxu0 %v1591_v5 }
 0x169   :  { %v294_v28 = vpop.permute.xlu1 %293 }
 0x16a   :  { %1383 = vmatmul.mubr.msk.bf16.gmra.mrb[12].mxu0 %vm205_vm2, %v294_v28 }
 0x16b   :  { %637 = vmatprep.mubr.bf16.mxu0 %v1442_v61  ;;  %610 = vmatpush1.bf16.msra.mxu0 %v1597_v6 }
 0x16c   :  { %611 = vmatprep.subr.bf16.mxu0 %v1603_v7 }
 0x16f   :  { %612 = vmatpush1.bf16.msra.mxu0 %v1609_v8 }
 0x170   :  { %613 = vmatprep.subr.bf16.mxu0 %v1615_v12 }
 0x173   :  { %614 = vmatpush1.bf16.msra.mxu0 %v1621_v13 }
 0x174   :  { %615 = vmatprep.subr.bf16.mxu0 %v1627_v14 }
 0x177   :  { %616 = vmatpush1.bf16.msra.mxu0 %v1416_v15 }
 0x178   :  { %617 = vmatprep.subr.bf16.mxu0 %v1421_v16 }
 0x17b   :  { %618 = vmatpush1.bf16.msra.mxu0 %v1419_v17 }
 0x1bf   :  { %v1364_v35 = vpop.f32.mrb[0].mxu1 }
 0x1c0   :  { %v386_v36 = vadd.f32 %v1364_v35, %v377_v34  ;;  %v252_v37 = vpop.f32.mrb[1].mxu1 }
 0x1c1   :  { %v382_v38 = vadd.f32 %v377_v34, %v252_v37  ;;  %v1365_v39 = vpop.f32.mrb[2].mxu1 }
 0x1c2   :  { %v388_v40 = vadd.f32 %v1365_v39, %v377_v34  ;;  %v255_v41 = vpop.f32.mrb[3].mxu1  ;;  %v402_v43 = vmax.f32 %v386_v36, 0.0 }
 0x1c3   :  { %v384_v42 = vadd.f32 %v377_v34, %v255_v41  ;;  %v398_v45 = vmax.f32 %v382_v38, 0.0 }
 0x1c4   :  { %v404_v44 = vmax.f32 %v388_v40, 0.0 }
 0x1c5   :  { %v400_v46 = vmax.f32 %v384_v42, 0.0 }
 0x1c6   :  { %v1555_v47 = vpack.c.bf16 %v404_v44, %v402_v43 }
 0x1c7   :  { %v1557_v48 = vpack.c.bf16 %v400_v46, %v398_v45  ;;  %v1368_v49 = vpop.f32.mrb[4].mxu1 }
 0x1c8   :  { %v394_v50 = vadd.f32 %v1368_v49, %v377_v34  ;;  %v268_v51 = vpop.f32.mrb[5].mxu1 }
 0x1c9   :  { %v390_v52 = vadd.f32 %v377_v34, %v268_v51  ;;  %v1369_v53 = vpop.f32.mrb[6].mxu1 }
 0x1ca   :  { %v396_v54 = vadd.f32 %v1369_v53, %v377_v34  ;;  %v271_v55 = vpop.f32.mrb[7].mxu1  ;;  %v410_v57 = vmax.f32 %v394_v50, 0.0 }
 0x1cb   :  { %v392_v56 = vadd.f32 %v377_v34, %v271_v55  ;;  %v406_v59 = vmax.f32 %v390_v52, 0.0 }
 0x1cc   :  { %v412_v58 = vmax.f32 %v396_v54, 0.0  ;;  %v1426_v54 = vld [vmem:[%s1873_s4] sm:$0xff]  }
 0x1cd   :  { %v408_v60 = vmax.f32 %v392_v56, 0.0  ;;  %v1427_v56 = vld [vmem:[%s1873_s4 + $0x48] sm:$0xff]  }
 0x1ce   :  { %v1561_v62 = vpack.c.bf16 %v412_v58, %v410_v57  ;;  %v1428_v57 = vld [vmem:[%s1873_s4 + $0x8] sm:$0xff]  }
 0x1cf   :  { %v1563_v63 = vpack.c.bf16 %v408_v60, %v406_v59  ;;  %v1429_v59 = vld [vmem:[%s1873_s4 + $0x50] sm:$0xff]  }
 0x1d0   :  { %v423_v51 = vsel %vm100_vm1, %v1561_v62, 0 }
 0x235   :  { %v1380_v20 = vpop.f32.mrb[8].mxu0 }
 0x236   :  { %v387_v21 = vadd.f32 %v1380_v20, %v381_v19  ;;  %v341_v22 = vpop.f32.mrb[9].mxu0 }
 0x237   :  { %v383_v23 = vadd.f32 %v381_v19, %v341_v22  ;;  %v1381_v24 = vpop.f32.mrb[10].mxu0 }
 0x238   :  { %v389_v25 = vadd.f32 %v1381_v24, %v381_v19  ;;  %v344_v26 = vpop.f32.mrb[11].mxu0  ;;  %v403_v28 = vmax.f32 %v387_v21, 0.0  ;;  %v1436_v24 = vld [vmem:[%s1873_s4 + $0x28] sm:$0xff]  }
 0x239   :  { %v385_v27 = vadd.f32 %v381_v19, %v344_v26  ;;  %v399_v32 = vmax.f32 %v383_v23, 0.0  ;;  %v1439_v26 = vld [vmem:[%s1873_s4 + $0x78] sm:$0xff]  }
 0x23a   :  { %v405_v29 = vmax.f32 %v389_v25, 0.0  ;;  %v1438_v25 = vld [vmem:[%s1873_s4 + $0x30] sm:$0xff]  }
 0x23b   :  { %v401_v34 = vmax.f32 %v385_v27, 0.0  ;;  %v1440_v27 = vld [vmem:[%s1873_s4 + $0x38] sm:$0xff]  }
 0x23c   :  { %v417_v35 = vpack.c.bf16 %v405_v29, %v403_v28  ;;  %v43_v28 = vld [vmem:[%s1871_s5] sm:$0x2]  ;;  %v886_v29 = vsub.s32 2, %v1544_v30 }
 0x23d   :  { %v415_v36 = vpack.c.bf16 %v401_v34, %v399_v32  ;;  %v1384_v37 = vpop.f32.mrb[12].mxu0  ;;  %v883_v32 = vunpack.c.l.bf16 %v43_v28 }
 0x23e   :  { %v395_v38 = vadd.f32 %v1384_v37, %v381_v19  ;;  %v357_v31 = vpop.f32.mrb[13].mxu0 }
 0x23f   :  { %v391_v39 = vadd.f32 %v381_v19, %v357_v31  ;;  %v1385_v40 = vpop.f32.mrb[14].mxu0  ;;  %428 = vmatprep.subr.bf16.mxu1 %v415_v36  ;;  %v1736_v34 = vrot.slane %v883_v32, %v886_v29  ;;  %v42_v36 = vld [vmem:[%s1871_s5 + $0x8] sm:$0x11] }
 0x240   :  { %v397_v33 = vadd.f32 %v1385_v40, %v381_v19  ;;  %v360_v41 = vpop.f32.mrb[15].mxu0  ;;  %429 = vmatpush1.bf16.msra.mxu1 %v1557_v48  ;;  %v411_v43 = vmax.f32 %v395_v38, 0.0  ;;  %v757_v38 = vsub.s32 1, %v1544_v30  ;;  %v754_v40 = vunpack.c.h.bf16 %v42_v36 }
 0x241   :  { %v393_v42 = vadd.f32 %v381_v19, %v360_v41  ;;  %430 = vmatprep.subr.bf16.mxu1 %v417_v35  ;;  %v407_v45 = vmax.f32 %v391_v39, 0.0  ;;  %1059 = vrot.lane.b32.xlu0 %v1736_v34, %s1441_s0  ;;  %v41_v35 = vld [vmem:[%s1871_s5] sm:$0x11]  ;;  %v753_v39 = vunpack.c.l.bf16 %v42_v36 }
 0x242   :  { %v413_v44 = vmax.f32 %v397_v33, 0.0  ;;  %v751_v37 = vunpack.c.l.bf16 %v41_v35  ;;  %v752_v31 = vunpack.c.h.bf16 %v41_v35 }
 0x243   :  { %v409_v46 = vmax.f32 %v393_v42, 0.0  ;;  %v1751_v42 = vrot.slane %v753_v39, %v757_v38 }
 0x244   :  { %v421_v49 = vpack.c.bf16 %v413_v44, %v411_v43  ;;  %431 = vmatpush1.bf16.msra.mxu1 %v1555_v47  ;;  %v1747_v33 = vrot.slane %v751_v37, %v757_v38  ;;  %v1749_v41 = vrot.slane %v752_v31, %v757_v38  ;;  %v1753_v43 = vrot.slane %v754_v40, %v757_v38 }
 0x245   :  { %v419_v50 = vpack.c.bf16 %v409_v46, %v407_v45 }
 0x247   :  { %432 = vmatprep.subr.bf16.mxu1 %v419_v50 }
 0x248   :  { %433 = vmatpush1.bf16.msra.mxu1 %v1563_v63 }
 0x249   :  { %1197 = vmatprep.subr.msk.bf16.mxu1 %vm100_vm1, %v421_v49 }
 0x24c   :  { %435 = vmatpush1.bf16.msra.mxu1 %v423_v51 }
 0x24d   :  { %678 = vmatprep.subr.bf16.mxu1 %v1573_v1  ;;  %v1430_v1 = vld [vmem:[%s1873_s4 + $0x10] sm:$0xff]  }
 0x24f   :  { %1198 = vmatmul.mubr.msk.bf16.vlgmr.msra.gmra.mrb[8].mxu1 %vm87_vm0, %v1490_v3  ;;  %v1424_v3 = vld [vmem:[%s1872_s3 + $0x74] ss:$8 sps:$4 sm:$0xff]  }
 0x250   :  { %470 = vmatprep.mubr.bf16.mxu1 %v1442_v61  ;;  %679 = vmatpush1.bf16.msra.mxu1 %v1568_v0 }
 0x251   :  { %680 = vmatprep.subr.bf16.mxu1 %v1578_v2  ;;  %619 = vmatprep.subr.bf16.mxu0 %v1424_v3 }
 0x254   :  { %681 = vmatpush1.bf16.msra.mxu1 %v1585_v4  ;;  %v1431_v4 = vld [vmem:[%s1873_s4 + $0x58] sm:$0xff]  }
 0x255   :  { %682 = vmatprep.subr.bf16.mxu1 %v1591_v5  ;;  %v1432_v5 = vld [vmem:[%s1873_s4 + $0x18] sm:$0xff]  }
 0x257   :  { %1199 = vmatmul.mubr.msk.bf16.gmra.mrb[12].mxu1 %vm87_vm0, %v1511_v9  ;;  %v1422_v9 = vld [vmem:[%s1872_s3 + $0x70] ss:$8 sps:$4 sm:$0xff]  }
 0x258   :  { %480 = vmatprep.mubr.bf16.mxu1 %v1442_v61  ;;  %683 = vmatpush1.bf16.msra.mxu1 %v1597_v6 }
 0x259   :  { %684 = vmatprep.subr.bf16.mxu1 %v1603_v7  ;;  %620 = vmatpush1.bf16.msra.mxu0 %v1422_v9  ;;  %v1433_v7 = vld [vmem:[%s1873_s4 + $0x60] sm:$0xff]  }
 0x25c   :  { %685 = vmatpush1.bf16.msra.mxu1 %v1609_v8 }
 0x25d   :  { %686 = vmatprep.subr.bf16.mxu1 %v1615_v12 }
 0x25f   :  { %1200 = vmatmul.mubr.msk.bf16.gmra.mrb[16].mxu1 %vm87_vm0, %v1516_v10  ;;  %v1425_v10 = vld [vmem:[%s1873_s4 + $0x40] sm:$0xff]  }
 0x260   :  { %490 = vmatprep.mubr.bf16.mxu1 %v1442_v61  ;;  %687 = vmatpush1.bf16.msra.mxu1 %v1621_v13 }
 0x261   :  { %688 = vmatprep.subr.bf16.mxu1 %v1627_v14  ;;  %1258 = vmatprep.subr.bf16.mxu0 %v1425_v10 }
 0x264   :  { %689 = vmatpush1.bf16.msra.mxu1 %v1416_v15  ;;  %v1434_v15 = vld [vmem:[%s1873_s4 + $0x20] sm:$0xff]  }
 0x265   :  { %690 = vmatprep.subr.bf16.mxu1 %v1421_v16 }
 0x267   :  { %1201 = vmatmul.mubr.msk.bf16.gmra.mrb[20].mxu1 %vm87_vm0, %v1525_v11 }
 0x268   :  { %691 = vmatpush1.bf16.msra.mxu1 %v1419_v17  ;;  %710 = vmatprep.mubr.bf16.mxu1 %v1442_v61  ;;  %v1435_v17 = vld [vmem:[%s1873_s4 + $0x68] sm:$0xff]  }
 0x269   :  { %692 = vmatprep.subr.bf16.mxu1 %v1424_v3 }
 0x26c   :  { %693 = vmatpush1.bf16.msra.mxu1 %v1422_v9 }
 0x26d   :  { %1298 = vmatprep.subr.bf16.mxu1 %v1425_v10 }
 0x322   :  { %v462_v11 = vpop.f32.mrb[8].mxu1 }
 0x323   :  { %v464_v47 = vpop.f32.mrb[9].mxu1 }
 0x324   :  { %v466_v48 = vpop.f32.mrb[10].mxu1 }
 0x325   :  { %v501_v52 = vpack.c.bf16 %v466_v48, %v462_v11  ;;  %v468_v53 = vpop.f32.mrb[11].mxu1 }
 0x326   :  { %v502_v55 = vpack.c.bf16 %v468_v53, %v464_v47 }
 0x327   :  { %638 = vmatmul.mubr.bf16.vlgmr.msra.gmra.mrb[16].mxu0 %v501_v52 }
 0x328   :  { %711 = vmatmul.mubr.bf16.vlgmr.msra.gmra.mrb[24].mxu1 %v502_v55  ;;  %647 = vmatprep.mubr.bf16.mxu0 %v1442_v61 }
 0x329   :  { %720 = vmatprep.mubr.bf16.mxu1 %v1442_v61  ;;  %1259 = vmatpush3.bf16.msra.mxu0 %v1426_v54 }
 0x32a   :  { %v472_v58 = vpop.f32.mrb[12].mxu1  ;;  %1299 = vmatpush3.bf16.msra.mxu1 %v1426_v54  ;;  %1260 = vmatprep.subr.bf16.mxu0 %v1427_v56 }
 0x32b   :  { %v474_v60 = vpop.f32.mrb[13].mxu1  ;;  %1300 = vmatprep.subr.bf16.mxu1 %v1427_v56 }
 0x32c   :  { %v476_v62 = vpop.f32.mrb[14].mxu1 }
 0x32d   :  { %v503_v63 = vpack.c.bf16 %v476_v62, %v472_v58  ;;  %v478_v0 = vpop.f32.mrb[15].mxu1  ;;  %1261 = vmatpush3.bf16.msra.mxu0 %v1428_v57 }
 0x32e   :  { %v504_v2 = vpack.c.bf16 %v478_v0, %v474_v60  ;;  %1301 = vmatpush3.bf16.msra.mxu1 %v1428_v57  ;;  %1262 = vmatprep.subr.bf16.mxu0 %v1429_v59 }
 0x32f   :  { %648 = vmatmul.mubr.bf16.gmra.mrb[20].mxu0 %v503_v63  ;;  %1302 = vmatprep.subr.bf16.mxu1 %v1429_v59 }
 0x330   :  { %721 = vmatmul.mubr.bf16.gmra.mrb[28].mxu1 %v504_v2  ;;  %657 = vmatprep.mubr.bf16.mxu0 %v1442_v61 }
 0x331   :  { %730 = vmatprep.mubr.bf16.mxu1 %v1442_v61  ;;  %1263 = vmatpush3.bf16.msra.mxu0 %v1430_v1 }
 0x332   :  { %v482_v6 = vpop.f32.mrb[16].mxu1  ;;  %1303 = vmatpush3.bf16.msra.mxu1 %v1430_v1  ;;  %1264 = vmatprep.subr.bf16.mxu0 %v1431_v4 }
 0x333   :  { %v484_v8 = vpop.f32.mrb[17].mxu1  ;;  %1304 = vmatprep.subr.bf16.mxu1 %v1431_v4 }
 0x334   :  { %v486_v12 = vpop.f32.mrb[18].mxu1 }
 0x335   :  { %v505_v13 = vpack.c.bf16 %v486_v12, %v482_v6  ;;  %v488_v14 = vpop.f32.mrb[19].mxu1  ;;  %1265 = vmatpush3.bf16.msra.mxu0 %v1432_v5 }
 0x336   :  { %v506_v16 = vpack.c.bf16 %v488_v14, %v484_v8  ;;  %1305 = vmatpush3.bf16.msra.mxu1 %v1432_v5  ;;  %1266 = vmatprep.subr.bf16.mxu0 %v1433_v7 }
 0x337   :  { %658 = vmatmul.mubr.bf16.gmra.mrb[24].mxu0 %v505_v13  ;;  %1306 = vmatprep.subr.bf16.mxu1 %v1433_v7 }
 0x338   :  { %731 = vmatmul.mubr.bf16.gmra.mrb[32].mxu1 %v506_v16  ;;  %667 = vmatprep.mubr.bf16.mxu0 %v1442_v61 }
 0x339   :  { %740 = vmatprep.mubr.bf16.mxu1 %v1442_v61  ;;  %1267 = vmatpush3.bf16.msra.mxu0 %v1434_v15  ;;  %v1437_v61 = vld [vmem:[%s1873_s4 + $0x70] sm:$0xff]  }
 0x33a   :  { %v492_v18 = vpop.f32.mrb[20].mxu1  ;;  %1307 = vmatpush3.bf16.msra.mxu1 %v1434_v15  ;;  %1268 = vmatprep.subr.bf16.mxu0 %v1435_v17 }
 0x33b   :  { %v494_v19 = vpop.f32.mrb[21].mxu1  ;;  %1308 = vmatprep.subr.bf16.mxu1 %v1435_v17 }
 0x33c   :  { %v496_v20 = vpop.f32.mrb[22].mxu1 }
 0x33d   :  { %v507_v21 = vpack.c.bf16 %v496_v20, %v492_v18  ;;  %v498_v22 = vpop.f32.mrb[23].mxu1  ;;  %1269 = vmatpush3.bf16.msra.mxu0 %v1436_v24 }
 0x33e   :  { %v508_v23 = vpack.c.bf16 %v498_v22, %v494_v19  ;;  %1309 = vmatpush3.bf16.msra.mxu1 %v1436_v24  ;;  %1270 = vmatprep.subr.bf16.mxu0 %v1437_v61 }
 0x33f   :  { %668 = vmatmul.mubr.bf16.gmra.mrb[28].mxu0 %v507_v21  ;;  %1310 = vmatprep.subr.bf16.mxu1 %v1437_v61 }
 0x340   :  { %741 = vmatmul.mubr.bf16.gmra.mrb[36].mxu1 %v508_v23 }
 0x341   :  { %1271 = vmatpush3.bf16.msra.mxu0 %v1438_v25 }
 0x342   :  { %1311 = vmatpush3.bf16.msra.mxu1 %v1438_v25  ;;  %1272 = vmatprep.subr.bf16.mxu0 %v1439_v26 }
 0x343   :  { %1312 = vmatprep.subr.bf16.mxu1 %v1439_v26 }
 0x345   :  { %1273 = vmatpush3.bf16.msra.mxu0 %v1440_v27 }
 0x346   :  { %1313 = vmatpush3.bf16.msra.mxu1 %v1440_v27 }
 0x3fa   :  { %v639_v44 = vpop.f32.mrb[16].mxu0 }
 0x3fb   :  { %v771_v45 = vadd.f32 %v1747_v33, %v639_v44  ;;  %v641_v46 = vpop.f32.mrb[17].mxu0  ;;  %v712_v49 = vpop.f32.mrb[24].mxu1 }
 0x3fc   :  { %v772_v50 = vadd.f32 %v1749_v41, %v641_v46  ;;  %v773_v30 = vadd.f32 %v1751_v42, %v712_v49  ;;  %v643_v51 = vpop.f32.mrb[18].mxu0  ;;  %v714_v3 = vpop.f32.mrb[25].mxu1 }
 0x3fd   :  { %v775_v9 = vadd.f32 %v1747_v33, %v643_v51  ;;  %v774_v10 = vadd.f32 %v1753_v43, %v714_v3  ;;  %v645_v11 = vpop.f32.mrb[19].mxu0  ;;  %v716_v47 = vpop.f32.mrb[26].mxu1  ;;  %v803_v54 = vmax.f32 %v771_v45, 0.0 }
 0x3fe   :  { %v776_v48 = vadd.f32 %v1749_v41, %v645_v11  ;;  %v777_v52 = vadd.f32 %v1751_v42, %v716_v47  ;;  %v718_v53 = vpop.f32.mrb[27].mxu1  ;;  %v804_v57 = vmax.f32 %v772_v50, 0.0  ;;  %v805_v58 = vmax.f32 %v773_v30, 0.0 }
 0x3ff   :  { %v807_v55 = vmax.f32 %v775_v9, 0.0  ;;  %v778_v56 = vadd.f32 %v1753_v43, %v718_v53  ;;  %v806_v63 = vmax.f32 %v774_v10, 0.0 }
 0x400   :  { %v808_v59 = vmax.f32 %v776_v48, 0.0  ;;  %v809_v60 = vmax.f32 %v777_v52, 0.0 }
 0x401   :  { %v835_v62 = vpack.c.bf16 %v807_v55, %v803_v54  ;;  %v810_v0 = vmax.f32 %v778_v56, 0.0 }
 0x402   :  { %v836_v1 = vpack.c.bf16 %v808_v59, %v804_v57  ;;  %v837_v2 = vpack.c.bf16 %v809_v60, %v805_v58  ;;  %v649_v4 = vpop.f32.mrb[20].mxu0 }
 0x403   :  { %v838_v5 = vpack.c.bf16 %v810_v0, %v806_v63  ;;  %v779_v6 = vadd.f32 %v1747_v33, %v649_v4  ;;  %v651_v7 = vpop.f32.mrb[21].mxu0  ;;  %v722_v8 = vpop.f32.mrb[28].mxu1 }
 0x404   :  { %v780_v12 = vadd.f32 %v1749_v41, %v651_v7  ;;  %v781_v13 = vadd.f32 %v1751_v42, %v722_v8  ;;  %v653_v14 = vpop.f32.mrb[22].mxu0  ;;  %v724_v15 = vpop.f32.mrb[29].mxu1  ;;  %1016 = vmatprep.mubr.bf16.mxu0 %v836_v1 }
 0x405   :  { %v783_v16 = vadd.f32 %v1747_v33, %v653_v14  ;;  %v782_v17 = vadd.f32 %v1753_v43, %v724_v15  ;;  %v655_v18 = vpop.f32.mrb[23].mxu0  ;;  %v726_v19 = vpop.f32.mrb[30].mxu1  ;;  %1017 = vmatmul.mubr.bf16.vlgmr.msra.gmra.mrb[32].mxu0 %v835_v62  ;;  %1094 = vmatprep.mubr.bf16.mxu1 %v838_v5  ;;  %v811_v23 = vmax.f32 %v779_v6, 0.0 }
 0x406   :  { %v784_v20 = vadd.f32 %v1749_v41, %v655_v18  ;;  %v785_v21 = vadd.f32 %v1751_v42, %v726_v19  ;;  %v728_v22 = vpop.f32.mrb[31].mxu1  ;;  %1095 = vmatmul.mubr.bf16.vlgmr.msra.gmra.mrb[40].mxu1 %v837_v2  ;;  %v812_v25 = vmax.f32 %v780_v12, 0.0  ;;  %v813_v26 = vmax.f32 %v781_v13, 0.0 }
 0x407   :  { %v815_v24 = vmax.f32 %v783_v16, 0.0  ;;  %v786_v61 = vadd.f32 %v1753_v43, %v728_v22  ;;  %v814_v32 = vmax.f32 %v782_v17, 0.0 }
 0x408   :  { %v816_v27 = vmax.f32 %v784_v20, 0.0  ;;  %v817_v28 = vmax.f32 %v785_v21, 0.0 }
 0x409   :  { %v839_v29 = vpack.c.bf16 %v815_v24, %v811_v23  ;;  %v818_v35 = vmax.f32 %v786_v61, 0.0 }
 0x40a   :  { %v840_v36 = vpack.c.bf16 %v816_v27, %v812_v25  ;;  %v841_v37 = vpack.c.bf16 %v817_v28, %v813_v26  ;;  %v659_v38 = vpop.f32.mrb[24].mxu0 }
 0x40b   :  { %v842_v31 = vpack.c.bf16 %v818_v35, %v814_v32  ;;  %v787_v39 = vadd.f32 %v1747_v33, %v659_v38  ;;  %v661_v40 = vpop.f32.mrb[25].mxu0  ;;  %v732_v44 = vpop.f32.mrb[32].mxu1 }
 0x40c   :  { %v788_v45 = vadd.f32 %v1749_v41, %v661_v40  ;;  %v789_v46 = vadd.f32 %v1751_v42, %v732_v44  ;;  %v663_v49 = vpop.f32.mrb[26].mxu0  ;;  %v734_v50 = vpop.f32.mrb[33].mxu1  ;;  %1024 = vmatprep.mubr.bf16.mxu0 %v840_v36 }
 0x40d   :  { %v791_v30 = vadd.f32 %v1747_v33, %v663_v49  ;;  %v790_v51 = vadd.f32 %v1753_v43, %v734_v50  ;;  %v665_v3 = vpop.f32.mrb[27].mxu0  ;;  %v736_v9 = vpop.f32.mrb[34].mxu1  ;;  %1025 = vmatmul.mubr.bf16.gmra.mrb[36].mxu0 %v839_v29  ;;  %1102 = vmatprep.mubr.bf16.mxu1 %v842_v31  ;;  %v819_v48 = vmax.f32 %v787_v39, 0.0 }
 0x40e   :  { %v792_v10 = vadd.f32 %v1749_v41, %v665_v3  ;;  %v793_v11 = vadd.f32 %v1751_v42, %v736_v9  ;;  %v738_v47 = vpop.f32.mrb[35].mxu1  ;;  %1103 = vmatmul.mubr.bf16.gmra.mrb[44].mxu1 %v841_v37  ;;  %v820_v54 = vmax.f32 %v788_v45, 0.0  ;;  %v821_v55 = vmax.f32 %v789_v46, 0.0 }
 0x40f   :  { %v823_v52 = vmax.f32 %v791_v30, 0.0  ;;  %v794_v53 = vadd.f32 %v1753_v43, %v738_v47  ;;  %v822_v59 = vmax.f32 %v790_v51, 0.0 }
 0x410   :  { %v824_v56 = vmax.f32 %v792_v10, 0.0  ;;  %v825_v57 = vmax.f32 %v793_v11, 0.0 }
 0x411   :  { %v843_v58 = vpack.c.bf16 %v823_v52, %v819_v48  ;;  %v826_v60 = vmax.f32 %v794_v53, 0.0 }
 0x412   :  { %v844_v62 = vpack.c.bf16 %v824_v56, %v820_v54  ;;  %v845_v63 = vpack.c.bf16 %v825_v57, %v821_v55  ;;  %v669_v0 = vpop.f32.mrb[28].mxu0 }
 0x413   :  { %v846_v1 = vpack.c.bf16 %v826_v60, %v822_v59  ;;  %v795_v2 = vadd.f32 %v1747_v33, %v669_v0  ;;  %v671_v4 = vpop.f32.mrb[29].mxu0  ;;  %v742_v5 = vpop.f32.mrb[36].mxu1 }
 0x414   :  { %v796_v6 = vadd.f32 %v1749_v41, %v671_v4  ;;  %v797_v7 = vadd.f32 %v1751_v42, %v742_v5  ;;  %v673_v8 = vpop.f32.mrb[30].mxu0  ;;  %v744_v12 = vpop.f32.mrb[37].mxu1  ;;  %1032 = vmatprep.mubr.bf16.mxu0 %v844_v62 }
 0x415   :  { %v799_v13 = vadd.f32 %v1747_v33, %v673_v8  ;;  %v798_v14 = vadd.f32 %v1753_v43, %v744_v12  ;;  %v675_v15 = vpop.f32.mrb[31].mxu0  ;;  %v746_v16 = vpop.f32.mrb[38].mxu1  ;;  %1033 = vmatmul.mubr.bf16.gmra.mrb[40].mxu0 %v843_v58  ;;  %1110 = vmatprep.mubr.bf16.mxu1 %v846_v1  ;;  %v827_v20 = vmax.f32 %v795_v2, 0.0 }
 0x416   :  { %v800_v17 = vadd.f32 %v1749_v41, %v675_v15  ;;  %v801_v18 = vadd.f32 %v1751_v42, %v746_v16  ;;  %v748_v19 = vpop.f32.mrb[39].mxu1  ;;  %1111 = vmatmul.mubr.bf16.gmra.mrb[48].mxu1 %v845_v63  ;;  %v828_v23 = vmax.f32 %v796_v6, 0.0  ;;  %v829_v24 = vmax.f32 %v797_v7, 0.0  ;;  %v1787_v42 = vpop.permute.xlu0 %1059 }
 0x417   :  { %v831_v21 = vmax.f32 %v799_v13, 0.0  ;;  %v802_v22 = vadd.f32 %v1753_v43, %v748_v19  ;;  %v830_v26 = vmax.f32 %v798_v14, 0.0 }
 0x418   :  { %v832_v61 = vmax.f32 %v800_v17, 0.0  ;;  %v833_v33 = vmax.f32 %v801_v18, 0.0 }
 0x419   :  { %v847_v25 = vpack.c.bf16 %v831_v21, %v827_v20  ;;  %v834_v27 = vmax.f32 %v802_v22, 0.0 }
 0x41a   :  { %v848_v28 = vpack.c.bf16 %v832_v61, %v828_v23  ;;  %v849_v29 = vpack.c.bf16 %v833_v33, %v829_v24 }
 0x41b   :  { %v850_v32 = vpack.c.bf16 %v834_v27, %v830_v26 }
 0x41c   :  { %1040 = vmatprep.mubr.bf16.mxu0 %v848_v28 }
 0x41d   :  { %1041 = vmatmul.mubr.bf16.gmra.mrb[44].mxu0 %v847_v25  ;;  %1118 = vmatprep.mubr.bf16.mxu1 %v850_v32 }
 0x41e   :  { %1119 = vmatmul.mubr.bf16.gmra.mrb[52].mxu1 %v849_v29 }
 0x4d8   :  { %v1274_v41 = vpop.f32.mrb[32].mxu0 }
 0x4d9   :  { %v1275_v35 = vpop.f32.mrb[33].mxu0  ;;  %v1314_v36 = vpop.f32.mrb[40].mxu1 }
 0x4da   :  { %v1276_v43 = vadd.f32 %v1275_v35, %v1274_v41  ;;  %v1277_v37 = vpop.f32.mrb[34].mxu0  ;;  %v1315_v38 = vpop.f32.mrb[41].mxu1 }
 0x4db   :  { %v1316_v31 = vadd.f32 %v1315_v38, %v1314_v36  ;;  %v1278_v39 = vpop.f32.mrb[35].mxu0  ;;  %v1317_v40 = vpop.f32.mrb[42].mxu1 }
 0x4dc   :  { %v1019_v44 = vadd.f32 %v1276_v43, %v1736_v34  ;;  %v1279_v45 = vadd.f32 %v1278_v39, %v1277_v37  ;;  %v1318_v46 = vpop.f32.mrb[43].mxu1 }
 0x4dd   :  { %v1319_v49 = vadd.f32 %v1318_v46, %v1317_v40  ;;  %v1097_v50 = vadd.f32 %v1316_v31, %v1787_v42 }
 0x4de   :  { %1049 = vst.msk [vmem:[%s1874_s6] sm:$0xff] %vm205_vm2, %v1019_v44  ;;  %v1022_v30 = vadd.f32 %v1279_v45, %v1736_v34 }
 0x4df   :  { %v1100_v51 = vadd.f32 %v1319_v49, %v1787_v42  ;;  %1135 = vrot.lane.b32.xlu1 %v1097_v50, %s1441_s0 }
 0x4e0   :  { %1050 = vst.msk [vmem:[%s1874_s6 + $0x8] sm:$0xff] %vm205_vm2, %v1022_v30  ;;  %v1280_v3 = vpop.f32.mrb[36].mxu0 }
 0x4e1   :  { %v1281_v9 = vpop.f32.mrb[37].mxu0  ;;  %v1320_v10 = vpop.f32.mrb[44].mxu1  ;;  %1137 = vrot.lane.b32.xlu0 %v1100_v51, %s1441_s0 }
 0x4e2   :  { %v1282_v11 = vadd.f32 %v1281_v9, %v1280_v3  ;;  %v1283_v47 = vpop.f32.mrb[38].mxu0  ;;  %v1321_v48 = vpop.f32.mrb[45].mxu1 }
 0x4e3   :  { %v1322_v52 = vadd.f32 %v1321_v48, %v1320_v10  ;;  %v1284_v53 = vpop.f32.mrb[39].mxu0  ;;  %v1323_v54 = vpop.f32.mrb[46].mxu1 }
 0x4e4   :  { %v1027_v55 = vadd.f32 %v1282_v11, %v1736_v34  ;;  %v1285_v56 = vadd.f32 %v1284_v53, %v1283_v47  ;;  %v1324_v57 = vpop.f32.mrb[47].mxu1 }
 0x4e5   :  { %v1105_v58 = vadd.f32 %v1322_v52, %v1787_v42  ;;  %v1325_v59 = vadd.f32 %v1324_v57, %v1323_v54 }
 0x4e6   :  { %1051 = vst.msk [vmem:[%s1874_s6 + $0x10] sm:$0xff] %vm205_vm2, %v1027_v55  ;;  %v1030_v60 = vadd.f32 %v1285_v56, %v1736_v34 }
 0x4e7   :  { %v1108_v62 = vadd.f32 %v1325_v59, %v1787_v42  ;;  %1139 = vrot.lane.b32.xlu1 %v1105_v58, %s1441_s0 }
 0x4e8   :  { %1052 = vst.msk [vmem:[%s1874_s6 + $0x18] sm:$0xff] %vm205_vm2, %v1030_v60  ;;  %v1286_v63 = vpop.f32.mrb[40].mxu0 }
 0x4e9   :  { %v1287_v0 = vpop.f32.mrb[41].mxu0  ;;  %v1326_v1 = vpop.f32.mrb[48].mxu1  ;;  %1141 = vrot.lane.b32.xlu0 %v1108_v62, %s1441_s0 }
 0x4ea   :  { %v1288_v2 = vadd.f32 %v1287_v0, %v1286_v63  ;;  %v1289_v4 = vpop.f32.mrb[42].mxu0  ;;  %v1327_v5 = vpop.f32.mrb[49].mxu1 }
 0x4eb   :  { %v1328_v6 = vadd.f32 %v1327_v5, %v1326_v1  ;;  %v1290_v7 = vpop.f32.mrb[43].mxu0  ;;  %v1329_v8 = vpop.f32.mrb[50].mxu1 }
 0x4ec   :  { %v1035_v12 = vadd.f32 %v1288_v2, %v1736_v34  ;;  %v1291_v13 = vadd.f32 %v1290_v7, %v1289_v4  ;;  %v1330_v14 = vpop.f32.mrb[51].mxu1 }
 0x4ed   :  { %v1113_v15 = vadd.f32 %v1328_v6, %v1787_v42  ;;  %v1331_v16 = vadd.f32 %v1330_v14, %v1329_v8 }
 0x4ee   :  { %1053 = vst.msk [vmem:[%s1874_s6 + $0x20] sm:$0xff] %vm205_vm2, %v1035_v12  ;;  %v1038_v17 = vadd.f32 %v1291_v13, %v1736_v34 }
 0x4ef   :  { %v1116_v18 = vadd.f32 %v1331_v16, %v1787_v42  ;;  %1143 = vrot.lane.b32.xlu1 %v1113_v15, %s1441_s0 }
 0x4f0   :  { %1054 = vst.msk [vmem:[%s1874_s6 + $0x28] sm:$0xff] %vm205_vm2, %v1038_v17  ;;  %v1292_v19 = vpop.f32.mrb[44].mxu0 }
 0x4f1   :  { %v1293_v20 = vpop.f32.mrb[45].mxu0  ;;  %1145 = vrot.lane.b32.xlu0 %v1116_v18, %s1441_s0  ;;  %v1332_v21 = vpop.f32.mrb[52].mxu1 }
 0x4f2   :  { %v1294_v22 = vadd.f32 %v1293_v20, %v1292_v19  ;;  %v1295_v23 = vpop.f32.mrb[46].mxu0  ;;  %v1333_v24 = vpop.f32.mrb[53].mxu1 }
 0x4f3   :  { %v1334_v61 = vadd.f32 %v1333_v24, %v1332_v21  ;;  %v1296_v33 = vpop.f32.mrb[47].mxu0  ;;  %v1335_v25 = vpop.f32.mrb[54].mxu1 }
 0x4f4   :  { %v1043_v26 = vadd.f32 %v1294_v22, %v1736_v34  ;;  %v1297_v27 = vadd.f32 %v1296_v33, %v1295_v23  ;;  %v1336_v28 = vpop.f32.mrb[55].mxu1 }
 0x4f5   :  { %v1121_v29 = vadd.f32 %v1334_v61, %v1787_v42  ;;  %v1337_v32 = vadd.f32 %v1336_v28, %v1335_v25 }
 0x4f6   :  { %1055 = vst.msk [vmem:[%s1874_s6 + $0x30] sm:$0xff] %vm205_vm2, %v1043_v26  ;;  %v1046_v41 = vadd.f32 %v1297_v27, %v1736_v34 }
 0x4f7   :  { %v1124_v35 = vadd.f32 %v1337_v32, %v1787_v42  ;;  %1147 = vrot.lane.b32.xlu1 %v1121_v29, %s1441_s0 }
 0x4f8   :  { %1057 = vst.msk [vmem:[%s1874_s6 + $0x38] sm:$0xf] %vm1056_vm3, %v1046_v41 }
 0x4f9   :  { %1149 = vrot.lane.b32.xlu0 %v1124_v35, %s1441_s0 }
 0x551   :  { %v1136_v36 = vpop.permute.xlu1 %1135 }
 0x552   :  { %1160 = vst.msk [vmem:[%s1874_s6] sm:$0xff] %vm1159_vm4, %v1136_v36 }
 0x553   :  { %v1138_v43 = vpop.permute.xlu0 %1137 }
 0x554   :  { %1161 = vst.msk [vmem:[%s1874_s6 + $0x8] sm:$0xff] %vm1159_vm4, %v1138_v43 }
 0x559   :  { %v1140_v34 = vpop.permute.xlu1 %1139 }
 0x55a   :  { %1162 = vst.msk [vmem:[%s1874_s6 + $0x10] sm:$0xff] %vm1159_vm4, %v1140_v34 }
 0x55b   :  { %v1142_v42 = vpop.permute.xlu0 %1141 }
 0x55c   :  { %1163 = vst.msk [vmem:[%s1874_s6 + $0x18] sm:$0xff] %vm1159_vm4, %v1142_v42 }
 0x561   :  { %v1144_v37 = vpop.permute.xlu1 %1143 }
 0x562   :  { %1164 = vst.msk [vmem:[%s1874_s6 + $0x20] sm:$0xff] %vm1159_vm4, %v1144_v37 }
 0x563   :  { %v1146_v38 = vpop.permute.xlu0 %1145 }
 0x564   :  { %1165 = vst.msk [vmem:[%s1874_s6 + $0x28] sm:$0xff] %vm1159_vm4, %v1146_v38 }
 0x569   :  { %v1148_v31 = vpop.permute.xlu1 %1147 }
 0x56a   :  { %1166 = vst.msk [vmem:[%s1874_s6 + $0x30] sm:$0xff] %vm1159_vm4, %v1148_v31 }
 0x56b   :  { %v1150_v39 = vpop.permute.xlu0 %1149 }
 0x56c   :  { %1168 = vst.msk [vmem:[%s1874_s6 + $0x38] sm:$0xf] %vm1167_vm5, %v1150_v39 }

</bundles_post_ra>
